<compile_context>
chip_gen: v6e
topology: v6e:2x2x1
jax: 0.10.0
libtpu: 0.0.40
codegen_flags: <defaults>
</compile_context>

<pallas_src>
import jax
import jax.numpy as jnp
from jax.experimental import pallas as pl
from jax.experimental.pallas import tpu as pltpu

LANE = 128     # vreg lane width (last dim)
SUBLANE = 8    # vreg sublane height (second-to-last dim)


def _cdiv(a, b):
    return (a + b - 1) // b


def _round_up(n, m):
    return _cdiv(n, m) * m


def qnetwork_kernel(x_ref, w1_ref, b1_ref, w2_ref, b2_ref, o_ref):
    # Hidden layer: (TB, I) @ (I, H_pad) -> f32 acc, + bias, ReLU (all f32).
    h = jnp.dot(x_ref[...], w1_ref[...], preferred_element_type=jnp.float32)
    h = jnp.maximum(h + b1_ref[...], 0.0)
    # Match the MXU input dtype of the second layer explicitly (no-op for f32,
    # intentional downcast for the bf16 production path).
    h = h.astype(w2_ref.dtype)
    # Output layer: (TB, H_pad) @ (H_pad, O) -> f32 acc, + bias.
    out = jnp.dot(h, w2_ref[...], preferred_element_type=jnp.float32)
    o_ref[...] = (out + b2_ref[...]).astype(o_ref.dtype)


def init_qnetwork_params(key, input_size, hidden_size, output_size):
    """Deterministic init mimicking PyTorch nn.Linear default U(+/- 1/sqrt(fan_in))."""
    k1, k2, k3, k4 = jax.random.split(key, 4)
    bound1 = 1.0 / (input_size ** 0.5)
    bound2 = 1.0 / (hidden_size ** 0.5)
    # Stored [in, out] (transposed relative to PyTorch's [out, in]).
    w1 = jax.random.uniform(k1, (input_size, hidden_size), jnp.float32, -bound1, bound1)
    b1 = jax.random.uniform(k2, (hidden_size,), jnp.float32, -bound1, bound1)
    w2 = jax.random.uniform(k3, (hidden_size, output_size), jnp.float32, -bound2, bound2)
    b2 = jax.random.uniform(k4, (output_size,), jnp.float32, -bound2, bound2)
    return w1, b1, w2, b2


def pad_qnetwork_params(w1, b1, w2, b2, compute_dtype=jnp.float32):
    """Lane-pad ONLY the hidden dim H to 128. I and O keep their true sizes.

    Done once at init time, not per forward call.  `compute_dtype` is the MXU
    input dtype (f32 for exactness, bf16 for production); biases stay f32.
    """
    I, H = w1.shape
    H2, O = w2.shape
    assert H2 == H
    H_pad = _round_up(H, LANE)
    w1p = jnp.zeros((I, H_pad), compute_dtype).at[:, :H].set(w1.astype(compute_dtype))
    b1p = jnp.zeros((1, H_pad), jnp.float32).at[0, :H].set(b1.astype(jnp.float32))
    w2p = jnp.zeros((H_pad, O), compute_dtype).at[:H, :].set(w2.astype(compute_dtype))
    b2p = b2.reshape(1, O).astype(jnp.float32)
    return w1p, b1p, w2p, b2p


def _choose_batch_tile(B, max_tile=1024):
    """Balanced batch tile: <= max_tile rows, minimal padding, >=2 grid steps
    when B >= 16 so both v7x TensorCores get work."""
    n_steps = _cdiv(B, max_tile)
    if B >= 2 * SUBLANE:
        n_steps = max(n_steps, 2)
    return _round_up(_cdiv(B, n_steps), SUBLANE)


def qnetwork_forward(x, padded_params, *, max_batch_tile=1024):
    """x: [B, I] (any float dtype); padded_params from pad_qnetwork_params.
    Returns [B, O] in float32."""
    w1p, b1p, w2p, b2p = padded_params
    B, I = x.shape
    I_w, H_pad = w1p.shape
    assert I_w == I, "x feature dim must match w1 input dim"
    O = w2p.shape[1]
    compute_dtype = w1p.dtype

    TB = _choose_batch_tile(B, max_batch_tile)
    B_pad = _round_up(B, TB)

    # Only batch padding (when needed); feature dim stays at its true size I.
    if B_pad == B:
        x_in = x.astype(compute_dtype)
    else:
        x_in = jnp.zeros((B_pad, I), compute_dtype).at[:B, :].set(
            x.astype(compute_dtype))

    grid = (B_pad // TB,)
    in_itemsize = jnp.dtype(compute_dtype).itemsize
    flops = 2 * B_pad * (I * H_pad + H_pad * O)
    bytes_accessed = (
        in_itemsize * (B_pad * I + I * H_pad + H_pad * O)   # x, w1, w2
        + 4 * (H_pad + O)                                    # biases (f32)
        + 4 * B_pad * O                                      # output (f32)
    )

    out_pad = pl.pallas_call(
        qnetwork_kernel,
        out_shape=jax.ShapeDtypeStruct((B_pad, O), jnp.float32),
        grid_spec=pltpu.PrefetchScalarGridSpec(
            num_scalar_prefetch=0,
            grid=grid,
            in_specs=[
                # x tile marches over the batch axis; last dim = full I (legal).
                pl.BlockSpec((TB, I), lambda i: (i, 0)),
                # Weights/biases: same block every step -> VMEM-resident.
                pl.BlockSpec((I, H_pad), lambda i: (0, 0)),
                pl.BlockSpec((1, H_pad), lambda i: (0, 0)),
                pl.BlockSpec((H_pad, O), lambda i: (0, 0)),
                pl.BlockSpec((1, O), lambda i: (0, 0)),
            ],
            out_specs=pl.BlockSpec((TB, O), lambda i: (i, 0)),
        ),
        compiler_params=pltpu.CompilerParams(
            dimension_semantics=("parallel",),
        ),
        cost_estimate=pl.CostEstimate(
            flops=flops, transcendentals=0, bytes_accessed=bytes_accessed),
    )(x_in, w1p, b1p, w2p, b2p)

    # Drop padded batch rows (no-op slice when B_pad == B). No lane slice
    # needed: the output already has its true width O.
    return out_pad[:B]


if __name__ == "__main__":
    key = jax.random.PRNGKey(0)
    batch = 8
    input_size = 16
    hidden_size = 32
    output_size = 8

    k_x, k_p = jax.random.split(key)
    x = jax.random.normal(k_x, (batch, input_size), dtype=jnp.float32)
    w1, b1, w2, b2 = init_qnetwork_params(k_p, input_size, hidden_size, output_size)

    # Reference in plain JAX (same math as the PyTorch module).
    ref = jnp.maximum(x @ w1 + b1[None, :], 0.0) @ w2 + b2[None, :]

    # f32 MXU path: exact vs reference.
    params_f32 = pad_qnetwork_params(w1, b1, w2, b2, compute_dtype=jnp.float32)
    out_f32 = qnetwork_forward(x, params_f32)
    jax.block_until_ready(out_f32)
    assert out_f32.shape == (batch, output_size)
    assert jnp.allclose(out_f32, ref, atol=1e-5, rtol=1e-5)

    # bf16 MXU path (production config: halves x/weight HBM traffic; f32
    # accumulation and bias/ReLU). Looser tolerance due to bf16 mantissa.
    params_bf16 = pad_qnetwork_params(w1, b1, w2, b2, compute_dtype=jnp.bfloat16)
    out_bf16 = qnetwork_forward(x, params_bf16)
    jax.block_until_ready(out_bf16)
    assert out_bf16.shape == (batch, output_size)
    assert jnp.allclose(out_bf16, ref, atol=5e-2, rtol=5e-2)

    print("KERNEL_OK")
</pallas_src>

<mosaic_0001>
module attributes {stable_mosaic.version = 11 : i64} {
  func.func @qnetwork_kernel(%arg0: i32, %arg1: memref<8x16xf32, #tpu.memory_space<vmem>>, %arg2: memref<16x128xf32, #tpu.memory_space<vmem>>, %arg3: memref<1x128xf32, #tpu.memory_space<vmem>>, %arg4: memref<128x8xf32, #tpu.memory_space<vmem>>, %arg5: memref<1x8xf32, #tpu.memory_space<vmem>>, %arg6: memref<8x8xf32, #tpu.memory_space<vmem>>) attributes {dimension_semantics = [#tpu.dimension_semantics<parallel>], iteration_bounds = array<i64: 1>, scalar_prefetch = 0 : i64, scratch_operands = 0 : i64, tpu.core_type = #tpu.core_type<tc>, window_params = [{transform_indices = @transform_0, window_bounds = array<i64: 8, 16>}, {pipeline_mode = #tpu.pipeline_mode<synchronous>, transform_indices = @transform_1, window_bounds = array<i64: 16, 128>}, {pipeline_mode = #tpu.pipeline_mode<synchronous>, transform_indices = @transform_2, window_bounds = array<i64: 1, 128>}, {pipeline_mode = #tpu.pipeline_mode<synchronous>, transform_indices = @transform_3, window_bounds = array<i64: 128, 8>}, {pipeline_mode = #tpu.pipeline_mode<synchronous>, transform_indices = @transform_4, window_bounds = array<i64: 1, 8>}, {transform_indices = @transform_5, window_bounds = array<i64: 8, 8>}]} {
    %c0 = arith.constant 0 : index
    %c0_0 = arith.constant 0 : index
    %0 = vector.load %arg1[%c0, %c0_0] : memref<8x16xf32, #tpu.memory_space<vmem>>, vector<8x16xf32>
    %c0_1 = arith.constant 0 : index
    %c0_2 = arith.constant 0 : index
    %1 = vector.load %arg2[%c0_1, %c0_2] : memref<16x128xf32, #tpu.memory_space<vmem>>, vector<16x128xf32>
    %cst = arith.constant dense<0.000000e+00> : vector<8x128xf32>
    %2 = tpu.matmul %0, %1, %cst {dimension_numbers = #tpu.dot_dimension_numbers<[1], [0], [0], [1], [0, 0, 1, 1], [], []>} : vector<8x16xf32>, vector<16x128xf32>, vector<8x128xf32> -> vector<8x128xf32>
    %c0_3 = arith.constant 0 : index
    %c0_4 = arith.constant 0 : index
    %3 = vector.load %arg3[%c0_3, %c0_4] : memref<1x128xf32, #tpu.memory_space<vmem>>, vector<1x128xf32>
    %4 = vector.broadcast %3 : vector<1x128xf32> to vector<8x128xf32>
    %5 = arith.addf %2, %4 : vector<8x128xf32>
    %cst_5 = arith.constant 0.000000e+00 : f32
    %6 = vector.broadcast %cst_5 : f32 to vector<8x128xf32>
    %7 = arith.maximumf %5, %6 : vector<8x128xf32>
    %c0_6 = arith.constant 0 : index
    %c0_7 = arith.constant 0 : index
    %8 = vector.load %arg4[%c0_6, %c0_7] : memref<128x8xf32, #tpu.memory_space<vmem>>, vector<128x8xf32>
    %cst_8 = arith.constant dense<0.000000e+00> : vector<8x8xf32>
    %9 = tpu.matmul %7, %8, %cst_8 {dimension_numbers = #tpu.dot_dimension_numbers<[1], [0], [0], [1], [0, 0, 1, 1], [], []>} : vector<8x128xf32>, vector<128x8xf32>, vector<8x8xf32> -> vector<8x8xf32>
    %c0_9 = arith.constant 0 : index
    %c0_10 = arith.constant 0 : index
    %10 = vector.load %arg5[%c0_9, %c0_10] : memref<1x8xf32, #tpu.memory_space<vmem>>, vector<1x8xf32>
    %11 = vector.broadcast %10 : vector<1x8xf32> to vector<8x8xf32>
    %12 = arith.addf %9, %11 : vector<8x8xf32>
    %c0_11 = arith.constant 0 : index
    %c0_12 = arith.constant 0 : index
    %13 = vector.load %arg6[%c0_11, %c0_12] : memref<8x8xf32, #tpu.memory_space<vmem>>, vector<8x8xf32>
    tpu.vector_store %arg6[%c0_11, %c0_12], %12 {strides = array<i32>} : memref<8x8xf32, #tpu.memory_space<vmem>>, vector<8x8xf32>,
    return
  }
  func.func @transform_0(%arg0: i32) -> (i32, i32) {
    %c0_i32 = arith.constant 0 : i32
    %c0_i32_0 = arith.constant 0 : i32
    return %arg0, %c0_i32 : i32, i32
  }
  func.func @transform_1(%arg0: i32) -> (i32, i32) {
    %c0_i32 = arith.constant 0 : i32
    %c0_i32_0 = arith.constant 0 : i32
    %c0_i32_1 = arith.constant 0 : i32
    return %c0_i32, %c0_i32_0 : i32, i32
  }
  func.func @transform_2(%arg0: i32) -> (i32, i32) {
    %c0_i32 = arith.constant 0 : i32
    %c0_i32_0 = arith.constant 0 : i32
    %c0_i32_1 = arith.constant 0 : i32
    return %c0_i32, %c0_i32_0 : i32, i32
  }
  func.func @transform_3(%arg0: i32) -> (i32, i32) {
    %c0_i32 = arith.constant 0 : i32
    %c0_i32_0 = arith.constant 0 : i32
    %c0_i32_1 = arith.constant 0 : i32
    return %c0_i32, %c0_i32_0 : i32, i32
  }
  func.func @transform_4(%arg0: i32) -> (i32, i32) {
    %c0_i32 = arith.constant 0 : i32
    %c0_i32_0 = arith.constant 0 : i32
    %c0_i32_1 = arith.constant 0 : i32
    return %c0_i32, %c0_i32_0 : i32, i32
  }
  func.func @transform_5(%arg0: i32) -> (i32, i32) {
    %c0_i32 = arith.constant 0 : i32
    %c0_i32_0 = arith.constant 0 : i32
    return %arg0, %c0_i32 : i32, i32
  }
}

</mosaic_0001>

<bundles_post_ra>
// kernel: tpu_custom_call.1
= control target key start
LH: loop header
LB: loop body
LE: loop exit
PB: predicated region body
PF: predicated region fallthrough
CT: control target
= control target key end

     0   :  { %v305_v1 = vmov 0.0   ;;  %vm306_vm0 = vmmov 0   ;;  %vm31_vm1 = vcmask 130048   ;;  %s406_s0 = inlined_call_operand.vmem [shape: f32[8,16], index: 0, kind: input, shape index: {}]   ;;  %s407_s1 = inlined_call_operand.vmem [shape: f32[16,128], index: 1, kind: input, shape index: {}]   ;;  %s408_s2 = inlined_call_operand.vmem [shape: f32[1,128], index: 2, kind: input, shape index: {}]   ;;  %s409_s3 = inlined_call_operand.vmem [shape: f32[128,8], index: 3, kind: input, shape index: {}]   ;;  %s410_s4 = inlined_call_operand.vmem [shape: f32[1,8], index: 4, kind: input, shape index: {}]   ;;  %s411_s5 = inlined_call_operand.hbm [shape: f32[8,8], index: 5, kind: output, shape index: {}]  }
   0x1   :  { %v23_v0 = vld [vmem:[%s407_s1 + $0x8] sm:$0xff]  ;;  %238 = vmatprep.subr.mxu0 %v305_v1  ;;  %v22_v2 = vld [vmem:[%s407_s1] sm:$0xff]  ;;  %242 = vmatprep.mubr.msk.f32.mxu0 %vm306_vm0, %v305_v1  ;;  %v121_v3 = vld [vmem:[%s409_s3 + $0x78] sm:$0xff] }
   0x2   :  { %239 = vmatpush3.msra.mxu0 %v23_v0  ;;  %v21_v4 = vld [vmem:[%s406_s0] sm:$0xff]  ;;  %245 = vmatprep.subr.mxu1 %v305_v1  ;;  %v120_v5 = vld [vmem:[%s409_s3 + $0x70] sm:$0xff]  ;;  %v119_v6 = vld [vmem:[%s409_s3 + $0x68] sm:$0xff] }
   0x3   :  { %240 = vmatprep.subr.mxu0 %v305_v1  ;;  %246 = vmatpush3.msra.mxu1 %v121_v3 }
   0x4   :  { %241 = vmatpush3.msra.mxu0 %v22_v2  ;;  %247 = vmatprep.subr.mxu1 %v305_v1 }
   0x5   :  { %243 = vmatmul.mubr.msk.f32.vlgmr.msra.gmra.mxu0 %vm31_vm1, %v21_v4  ;;  %248 = vmatpush3.msra.mxu1 %v120_v5 }
   0x6   :  { %10 = vsyncpa [#allocation3], 0  ;;  %249 = vmatprep.subr.mxu1 %v305_v1  ;;  %v118_v7 = vld [vmem:[%s409_s3 + $0x60] sm:$0xff]  ;;  %277 = vmatprep.mubr.msk.f32.mxu1 %vm306_vm0, %v305_v1  ;;  %v117_v8 = vld [vmem:[%s409_s3 + $0x58] sm:$0xff]  ;;  %s307_s6 = smov [#allocation2]   ;;  %vm199_vm2 = vcmask 64512  }
   0x7   :  { %250 = vmatpush3.msra.mxu1 %v119_v6  ;;  %v116_v9 = vld [vmem:[%s409_s3 + $0x50] sm:$0xff]  ;;  %v115_v10 = vld [vmem:[%s409_s3 + $0x48] sm:$0xff]  ;;  %v114_v11 = vld [vmem:[%s409_s3 + $0x40] sm:$0xff]  ;;  %s207_s7 = sshll.u32 %s307_s6, 4  ;;  %s208_s7 = int_to_ptr.vmem [resolvable:$true] %s207_s7 }
   0x8   :  { %251 = vmatprep.subr.mxu1 %v305_v1  ;;  %v113_v12 = vld [vmem:[%s409_s3 + $0x38] sm:$0xff]  ;;  %v112_v13 = vld [vmem:[%s409_s3 + $0x30] sm:$0xff]  ;;  %v111_v14 = vld [vmem:[%s409_s3 + $0x28] sm:$0xff]  ;;  %p288_p1 = scmp.lt.s32.totalorder %s208_s7, %s208_s7 }
   0x9   :  { %252 = vmatpush3.msra.mxu1 %v118_v7  ;;  %v110_v15 = vld [vmem:[%s409_s3 + $0x20] sm:$0xff]  ;;  %v109_v16 = vld [vmem:[%s409_s3 + $0x18] sm:$0xff]  ;;  %v108_v17 = vld [vmem:[%s409_s3 + $0x10] sm:$0xff] }
   0xa   :  { %253 = vmatprep.subr.mxu1 %v305_v1  ;;  %v107_v18 = vld [vmem:[%s409_s3 + $0x8] sm:$0xff]  ;;  %v106_v19 = vld [vmem:[%s409_s3] sm:$0xff]  ;;  %s283_s3 = scalar_lea.vmem %s208_s7, 128 }
   0xb   :  { %254 = vmatpush3.msra.mxu1 %v117_v8  ;;  %v215_v20 = vld [vmem:[%s408_s2] ss:$0 sm:$0xff]  ;;  %p284_p0 = scmp.ne.s32.totalorder %s208_s7, %s283_s3  ;;  %p289_p2 = scmp.lt.s32.totalorder %s283_s3, %s283_s3 }
   0xc   :  { %255 = vmatprep.subr.mxu1 %v305_v1  ;;  %v217_v25 = vld [vmem:[%s410_s4] ss:$0 sm:$0xff] }
   0xd   :  { %256 = vmatpush3.msra.mxu1 %v116_v9  ;;  %p290_p3 = por %p289_p2, %p288_p1 }
   0xe   :  { %257 = vmatprep.subr.mxu1 %v305_v1 }
   0xf   :  { %258 = vmatpush3.msra.mxu1 %v115_v10  ;;  %p291_p4 = pnand %p290_p3, %p284_p0 }
  0x10   :  { %259 = vmatprep.subr.mxu1 %v305_v1 }
  0x11   :  { %260 = vmatpush3.msra.mxu1 %v114_v11 }
  0x12   :  { %261 = vmatprep.subr.mxu1 %v305_v1 }
  0x13   :  { %262 = vmatpush3.msra.mxu1 %v113_v12 }
  0x14   :  { %263 = vmatprep.subr.mxu1 %v305_v1 }
  0x15   :  { %264 = vmatpush3.msra.mxu1 %v112_v13 }
  0x16   :  { %265 = vmatprep.subr.mxu1 %v305_v1 }
  0x17   :  { %266 = vmatpush3.msra.mxu1 %v111_v14 }
  0x18   :  { %267 = vmatprep.subr.mxu1 %v305_v1 }
  0x19   :  { %268 = vmatpush3.msra.mxu1 %v110_v15 }
  0x1a   :  { %269 = vmatprep.subr.mxu1 %v305_v1 }
  0x1b   :  { %270 = vmatpush3.msra.mxu1 %v109_v16 }
  0x1c   :  { %271 = vmatprep.subr.mxu1 %v305_v1 }
  0x1d   :  { %272 = vmatpush3.msra.mxu1 %v108_v17 }
  0x1e   :  { %273 = vmatprep.subr.mxu1 %v305_v1 }
  0x1f   :  { %274 = vmatpush3.msra.mxu1 %v107_v18 }
  0x20   :  { %275 = vmatprep.subr.mxu1 %v305_v1 }
  0x21   :  { %276 = vmatpush3.msra.mxu1 %v106_v19 }
  0xc5   :  { %v101_v21 = vpop.f32.mrf.mxu0 }
  0xc6   :  { %v102_v22 = vadd.f32 %v215_v20, %v101_v21 }
  0xc7   :  { %v244_v23 = vpop.f32.mrf.mxu0 }
  0xc8   :  { %v105_v24 = vmax.f32 %v102_v22, 0.0 }
  0xca   :  { %278 = vmatmul.mubr.f32.vlgmr.msra.gmra.mxu1 %v105_v24 }
 0x18a   :  { %v195_v26 = vpop.f32.mrf.mxu1 }
 0x18b   :  { %v196_v27 = vadd.f32 %v217_v25, %v195_v26 }
 0x18c   :  { %v279_v28 = vpop.f32.mrf.mxu1 }
 0x18d   :  { %200 = vst.msk [vmem:[#allocation2] sm:$0xff] %vm199_vm2, %v196_v27 }
 0x18e   :  { %294 = shalt.err (!%p291_p4)
}
 0x18f   :  { %210 = dma.vmem_to_hbm [thread:$0]  %s208_s7, 128, %s411_s5, [#allocation3]  }
 0x190   :  { %303 = dma.done.wait [#allocation3], 128  }
 0x191   :  { %304 = vsyncadd [#allocation3], 4294967168 }
 0x192   :  { %214 = vsyncpa [#allocation3], 1 }

</bundles_post_ra>
